<compile_context>
chip_gen: v7x
topology: tpu7x:2x2x1
jax: 0.10.0
libtpu: 0.0.40
codegen_flags: <defaults>
</compile_context>

<pallas_src>
import functools

import jax
import jax.numpy as jnp
from jax.experimental import pallas as pl
from jax.experimental.pallas import tpu as pltpu


def gating_kernel(x_ref, w1_ref, w2_ref, o_ref):
    # x_ref : (TB, S)     f32   streamed batch tile (cast to bf16 in-kernel)
    # w1_ref: (S, H)      bf16  pinned in VMEM (constant index_map)
    # w2_ref: (H, E_pad)  bf16  pinned in VMEM (constant index_map)
    # o_ref : (TB, E_pad) bf16  lane-dense output tile
    x = x_ref[...].astype(jnp.bfloat16)  # in-kernel cast: no extra HBM pass over x
    h = jnp.dot(x, w1_ref[...], preferred_element_type=jnp.float32)
    h = jnp.maximum(h, 0.0)  # ReLU on the f32 accumulator (v5e has no bf16 VALU)
    out = jnp.dot(h.astype(jnp.bfloat16), w2_ref[...],
                  preferred_element_type=jnp.float32)
    o_ref[...] = out.astype(o_ref.dtype)


def _round_up(n, m):
    return ((n + m - 1) // m) * m


@functools.partial(jax.jit, static_argnames=("num_experts",))
def gating_forward(x, w1_bf, w2_bf_pad, *, num_experts):
    """x: (B, S, 1) f32, w1_bf: (S, H) bf16, w2_bf_pad: (H, E_pad) bf16 -> (B, E) f32."""
    x2d = jnp.squeeze(x, axis=-1)  # trailing unit-dim squeeze: free under jit
    B, S = x2d.shape
    S2, H = w1_bf.shape
    H2, E_pad = w2_bf_pad.shape
    assert S == S2 and H == H2

    # Batch tile: full extent for small B (single grid step, any B is legal as a
    # full-dim block); for large B scale the tile with B but keep >=2 grid steps
    # so dimension_semantics=("parallel",) shards across both v7x TensorCores.
    if B <= 512:
        TB = B
    else:
        TB = min(_round_up(pl.cdiv(B, 2), 512), 8192)
    grid = (pl.cdiv(B, TB),)  # ragged last block is masked by Pallas (no pre-pad)

    out = pl.pallas_call(
        gating_kernel,
        out_shape=jax.ShapeDtypeStruct((B, E_pad), jnp.bfloat16),
        grid_spec=pltpu.PrefetchScalarGridSpec(
            num_scalar_prefetch=0,
            grid=grid,
            in_specs=[
                pl.BlockSpec((TB, S), lambda i: (i, 0)),      # streamed x tiles (f32)
                pl.BlockSpec((S, H), lambda i: (0, 0)),       # pinned W1 (bf16)
                pl.BlockSpec((H, E_pad), lambda i: (0, 0)),   # pinned W2 (bf16, padded)
            ],
            out_specs=pl.BlockSpec((TB, E_pad), lambda i: (i, 0)),
        ),
        compiler_params=pltpu.CompilerParams(
            # Independent batch tiles -> megacore sharding on v7x; no-op on
            # single-TC v5e/v6e.
            dimension_semantics=("parallel",),
        ),
    )(x2d, w1_bf, w2_bf_pad)

    # Slice off the lane padding and restore the module's f32 output dtype
    # (tiny (B, E) op, fused under jit).
    return out[:, :num_experts].astype(jnp.float32)


class GatingNetworkPallas:
    """Mirrors GatingNetwork: Linear(S->H, no bias) -> ReLU -> Linear(H->E, no bias)."""

    E_PAD = 128  # lane-dense output width (unmasked vst); do NOT bump to 256

    def __init__(self, seq_len, hidden_size, num_experts, key):
        k1, k2 = jax.random.split(key)
        # Deterministic init mimicking nn.Linear's U(-1/sqrt(fan_in), 1/sqrt(fan_in)).
        b1 = 1.0 / jnp.sqrt(jnp.float32(seq_len))
        b2 = 1.0 / jnp.sqrt(jnp.float32(hidden_size))
        self.num_experts = num_experts
        # f32 master weights, stored already transposed vs PyTorch: (in, out).
        self.w1 = jax.random.uniform(k1, (seq_len, hidden_size),
                                     jnp.float32, minval=-b1, maxval=b1)
        self.w2 = jax.random.uniform(k2, (hidden_size, num_experts),
                                     jnp.float32, minval=-b2, maxval=b2)
        # Kernel-ready copies built ONCE: bf16 cast + W2 lane-padded to E_PAD.
        self.w1_bf = self.w1.astype(jnp.bfloat16)
        self.w2_bf_pad = jnp.pad(self.w2.astype(jnp.bfloat16),
                                 ((0, 0), (0, self.E_PAD - num_experts)))

    def __call__(self, x):
        # x: (B, seq_len, 1) -> (B, num_experts) f32
        return gating_forward(x, self.w1_bf, self.w2_bf_pad,
                              num_experts=self.num_experts)


if __name__ == "__main__":
    SEQ_LEN, HIDDEN, NUM_EXPERTS, BATCH = 16, 32, 4, 8

    key = jax.random.PRNGKey(0)
    k_x, k_params, k_big = jax.random.split(key, 3)

    net = GatingNetworkPallas(SEQ_LEN, HIDDEN, NUM_EXPERTS, k_params)

    # --- small-shape check (matches the module's natural config) ---
    x = jax.random.normal(k_x, (BATCH, SEQ_LEN, 1), dtype=jnp.float32)
    out = jax.block_until_ready(net(x))

    x2d = jnp.squeeze(x, axis=-1)
    ref = jnp.maximum(x2d @ net.w1, 0.0) @ net.w2
    assert out.shape == (BATCH, NUM_EXPERTS)
    # bf16 operands / output with f32 accumulation -> loose tolerance vs f32 ref.
    assert jnp.allclose(out, ref, atol=2e-2, rtol=2e-2)

    # --- larger batch: exercises the batch grid, pinned weights, ragged block ---
    BIG_B = 1000  # -> TB=512, grid=(2,), last block ragged (masked, no pre-pad)
    xb = jax.random.normal(k_big, (BIG_B, SEQ_LEN, 1), dtype=jnp.float32)
    outb = jax.block_until_ready(net(xb))
    refb = jnp.maximum(jnp.squeeze(xb, -1) @ net.w1, 0.0) @ net.w2
    assert outb.shape == (BIG_B, NUM_EXPERTS)
    assert jnp.allclose(outb, refb, atol=2e-2, rtol=2e-2)

    print("KERNEL_OK")
</pallas_src>

<mosaic_0001>
module attributes {stable_mosaic.version = 11 : i64} {
  func.func @gating_kernel(%arg0: i32, %arg1: memref<8x16xf32, #tpu.memory_space<vmem>>, %arg2: memref<16x32xbf16, #tpu.memory_space<vmem>>, %arg3: memref<32x128xbf16, #tpu.memory_space<vmem>>, %arg4: memref<8x128xbf16, #tpu.memory_space<vmem>>) attributes {dimension_semantics = [#tpu.dimension_semantics<parallel>], iteration_bounds = array<i64: 1>, scalar_prefetch = 0 : i64, scratch_operands = 0 : i64, tpu.core_type = #tpu.core_type<tc>, window_params = [{transform_indices = @transform_0, window_bounds = array<i64: 8, 16>}, {pipeline_mode = #tpu.pipeline_mode<synchronous>, transform_indices = @transform_1, window_bounds = array<i64: 16, 32>}, {pipeline_mode = #tpu.pipeline_mode<synchronous>, transform_indices = @transform_2, window_bounds = array<i64: 32, 128>}, {transform_indices = @transform_3, window_bounds = array<i64: 8, 128>}]} {
    %c0 = arith.constant 0 : index
    %c0_0 = arith.constant 0 : index
    %0 = vector.load %arg1[%c0, %c0_0] : memref<8x16xf32, #tpu.memory_space<vmem>>, vector<8x16xf32>
    %1 = arith.truncf %0 : vector<8x16xf32> to vector<8x16xbf16>
    %c0_1 = arith.constant 0 : index
    %c0_2 = arith.constant 0 : index
    %2 = vector.load %arg2[%c0_1, %c0_2] : memref<16x32xbf16, #tpu.memory_space<vmem>>, vector<16x32xbf16>
    %cst = arith.constant dense<0.000000e+00> : vector<8x32xf32>
    %3 = tpu.matmul %1, %2, %cst {dimension_numbers = #tpu.dot_dimension_numbers<[1], [0], [0], [1], [0, 0, 1, 1], [], []>} : vector<8x16xbf16>, vector<16x32xbf16>, vector<8x32xf32> -> vector<8x32xf32>
    %cst_3 = arith.constant 0.000000e+00 : f32
    %4 = vector.broadcast %cst_3 : f32 to vector<8x32xf32>
    %5 = arith.maximumf %3, %4 : vector<8x32xf32>
    %6 = arith.truncf %5 : vector<8x32xf32> to vector<8x32xbf16>
    %c0_4 = arith.constant 0 : index
    %c0_5 = arith.constant 0 : index
    %7 = vector.load %arg3[%c0_4, %c0_5] : memref<32x128xbf16, #tpu.memory_space<vmem>>, vector<32x128xbf16>
    %cst_6 = arith.constant dense<0.000000e+00> : vector<8x128xf32>
    %8 = tpu.matmul %6, %7, %cst_6 {dimension_numbers = #tpu.dot_dimension_numbers<[1], [0], [0], [1], [0, 0, 1, 1], [], []>} : vector<8x32xbf16>, vector<32x128xbf16>, vector<8x128xf32> -> vector<8x128xf32>
    %9 = arith.truncf %8 : vector<8x128xf32> to vector<8x128xbf16>
    %c0_7 = arith.constant 0 : index
    %c0_8 = arith.constant 0 : index
    %10 = vector.load %arg4[%c0_7, %c0_8] : memref<8x128xbf16, #tpu.memory_space<vmem>>, vector<8x128xbf16>
    tpu.vector_store %arg4[%c0_7, %c0_8], %9 {strides = array<i32>} : memref<8x128xbf16, #tpu.memory_space<vmem>>, vector<8x128xbf16>,
    return
  }
  func.func @transform_0(%arg0: i32) -> (i32, i32) {
    %c0_i32 = arith.constant 0 : i32
    %c0_i32_0 = arith.constant 0 : i32
    return %arg0, %c0_i32 : i32, i32
  }
  func.func @transform_1(%arg0: i32) -> (i32, i32) {
    %c0_i32 = arith.constant 0 : i32
    %c0_i32_0 = arith.constant 0 : i32
    %c0_i32_1 = arith.constant 0 : i32
    return %c0_i32, %c0_i32_0 : i32, i32
  }
  func.func @transform_2(%arg0: i32) -> (i32, i32) {
    %c0_i32 = arith.constant 0 : i32
    %c0_i32_0 = arith.constant 0 : i32
    %c0_i32_1 = arith.constant 0 : i32
    return %c0_i32, %c0_i32_0 : i32, i32
  }
  func.func @transform_3(%arg0: i32) -> (i32, i32) {
    %c0_i32 = arith.constant 0 : i32
    %c0_i32_0 = arith.constant 0 : i32
    return %arg0, %c0_i32 : i32, i32
  }
}

</mosaic_0001>

<bundles_post_ra>
// kernel: gating_forward.1
= control target key start
LH: loop header
LB: loop body
LE: loop exit
PB: predicated region body
PF: predicated region fallthrough
CT: control target
= control target key end

     0   :  { %8 = vsyncpa [#allocation3], 0  ;;  %s354_s0 = inlined_call_operand.hbm [shape: f32[8,16], index: 0, kind: input, shape index: {}]   ;;  %s355_s1 = inlined_call_operand.hbm [shape: bf16[16,32], index: 1, kind: input, shape index: {}]   ;;  %s356_s2 = inlined_call_operand.hbm [shape: bf16[32,128], index: 2, kind: input, shape index: {}]   ;;  %s357_s3 = inlined_call_operand.vmem [shape: bf16[8,128], index: 3, kind: output, shape index: {}]  }
   0x1   :  { %9 = vsyncpa [#allocation5], 0  ;;  %s282_s12 = smov [#allocation4]   ;;  %s212_s16 = scalar_lea.hbm %s355_s1, 128 }
   0x2   :  { %s25_s13 = sshll.u32 %s282_s12, 4  ;;  %p213_p0 = scmp.ne.s32.totalorder %s355_s1, %s212_s16  ;;  %s26_s13 = int_to_ptr.vmem [resolvable:$true] %s25_s13 }
   0x3   :  { %p216_p1 = scmp.lt.u32.totalorder %s212_s16, %s355_s1 }
   0x5   :  { %p218_p2 = pnand %p216_p1, %p213_p0 }
   0x7   :  { %221 = shalt.err (!%p218_p2)
}
   0x8   :  { %s222_s21 = scalar_lea.vmem %s26_s13, 128  ;;  %p227_p4 = scmp.lt.s32.totalorder %s26_s13, %s26_s13 }
   0x9   :  { %p223_p3 = scmp.ne.s32.totalorder %s26_s13, %s222_s21  ;;  %p228_p5 = scmp.lt.s32.totalorder %s222_s21, %s222_s21 }
   0xb   :  { %p229_p6 = por %p228_p5, %p227_p4 }
   0xd   :  { %p230_p7 = pnand %p229_p6, %p223_p3 }
   0xf   :  { %233 = shalt.err (!%p230_p7)
}
  0x10   :  { %s283_s22 = smov 64   ;;  %s284_s23 = smov 4  }
  0x11   :  { %31 = dma.hbm_to_vmem [thread:$0]  %s355_s1, 128, %s26_s13, [#allocation5], %s283_s22, %s283_s22, %s284_s23  }
  0x12   :  { %s285_s26 = smov [#allocation2]   ;;  %s286_s28 = smov [#allocation6]  }
  0x13   :  { %s16_s27 = sshll.u32 %s285_s26, 4  ;;  %s37_s29 = sshll.u32 %s286_s28, 4  ;;  %s17_s27 = int_to_ptr.vmem [resolvable:$true] %s16_s27  ;;  %s38_s29 = int_to_ptr.vmem [resolvable:$true] %s37_s29 }
  0x14   :  { %s234_s5 = scalar_lea.hbm %s354_s0, 128 }
  0x15   :  { %p235_p8 = scmp.ne.s32.totalorder %s354_s0, %s234_s5  ;;  %p238_p9 = scmp.lt.u32.totalorder %s234_s5, %s354_s0 }
  0x17   :  { %p240_p10 = pnand %p238_p9, %p235_p8 }
  0x19   :  { %243 = shalt.err (!%p240_p10)
}
  0x1a   :  { %s244_s1 = scalar_lea.vmem %s17_s27, 128  ;;  %p249_p12 = scmp.lt.s32.totalorder %s17_s27, %s17_s27 }
  0x1b   :  { %p245_p11 = scmp.ne.s32.totalorder %s17_s27, %s244_s1  ;;  %p250_p13 = scmp.lt.s32.totalorder %s244_s1, %s244_s1 }
  0x1d   :  { %p251_p0 = por %p250_p13, %p249_p12 }
  0x1f   :  { %p252_p1 = pnand %p251_p0, %p245_p11 }
  0x21   :  { %255 = shalt.err (!%p252_p1)
}
  0x22   :  { %19 = dma.hbm_to_vmem [thread:$0]  %s354_s0, 128, %s17_s27, [#allocation3]  }
  0x23   :  { %s256_s14 = scalar_lea.hbm %s356_s2, 256 }
  0x24   :  { %p257_p2 = scmp.ne.s32.totalorder %s356_s2, %s256_s14  ;;  %p260_p3 = scmp.lt.u32.totalorder %s256_s14, %s356_s2 }
  0x26   :  { %p262_p4 = pnand %p260_p3, %p257_p2 }
  0x28   :  { %265 = shalt.err (!%p262_p4)
}
  0x29   :  { %s266_s19 = scalar_lea.vmem %s38_s29, 256  ;;  %p271_p6 = scmp.lt.s32.totalorder %s38_s29, %s38_s29 }
  0x2a   :  { %p267_p5 = scmp.ne.s32.totalorder %s38_s29, %s266_s19  ;;  %p272_p7 = scmp.lt.s32.totalorder %s266_s19, %s266_s19 }
  0x2c   :  { %p273_p8 = por %p272_p7, %p271_p6 }
  0x2e   :  { %p274_p9 = pnand %p273_p8, %p267_p5 }
  0x30   :  { %277 = shalt.err (!%p274_p9)
}
  0x31   :  { %43 = dma.hbm_to_vmem [thread:$0]  %s356_s2, 256, %s38_s29, [#allocation5], %s283_s22, %s283_s22, %s284_s23  }
  0x32   :  { %278 = dma.done.wait [#allocation3], 128  }
  0x33   :  { %279 = vsyncadd [#allocation3], 4294967168 }
  0x34   :  { %280 = dma.done.wait [#allocation5], 384  }
  0x35   :  { %281 = vsyncadd [#allocation5], 4294966912  ;;  %v287_v0 = vmov 0.0   ;;  %vm288_vm0 = vmmov 0   ;;  %v209_v1 = vld [vmem:[#allocation4] sm:$0xff]   ;;  %v54_v2 = vld [vmem:[#allocation2] sm:$0xff] }
  0x36   :  { %188 = vmatprep.subr.bf16.mxu0 %v287_v0  ;;  %190 = vmatprep.mubr.msk.bf16.mxu0 %vm288_vm0, %v287_v0  ;;  %v55_v3 = vpack.c.bf16 %v54_v2, %v54_v2  ;;  %vm64_vm1 = vcmask 130048   ;;  %v210_v4 = vld [vmem:[#allocation6] sm:$0xff]   ;;  %v211_v5 = vld [vmem:[#allocation6 + $0x8] sm:$0xff]   ;;  %vm126_vm2 = vcmask 261120  }
  0x37   :  { %194 = vmatprep.subr.bf16.mxu1 %v287_v0  ;;  %198 = vmatprep.mubr.msk.bf16.mxu1 %vm288_vm0, %v287_v0 }
  0x38   :  { %189 = vmatpush3.bf16.msra.mxu0 %v209_v1  ;;  %195 = vmatpush3.bf16.msra.mxu1 %v210_v4 }
  0x39   :  { %196 = vmatprep.subr.bf16.mxu1 %v287_v0 }
  0x3b   :  { %191 = vmatmul.mubr.msk.bf16.vlgmr.msra.gmra.mrb[0].mxu0 %vm64_vm1, %v55_v3 }
  0x3c   :  { %197 = vmatpush3.bf16.msra.mxu1 %v211_v5 }
 0x10e   :  { %v102_v6 = vpop.f32.mrb[0].mxu0 }
 0x10f   :  { %v108_v7 = vmax.f32 %v102_v6, 0.0  ;;  %v192_v8 = vpop.f32.mrb[1].mxu0 }
 0x110   :  { %v105_v9 = vpop.f32.mrb[2].mxu0 }
 0x111   :  { %v109_v10 = vpack.c.bf16 %v108_v7, %v108_v7  ;;  %v193_v11 = vpop.f32.mrb[3].mxu0 }
 0x113   :  { %199 = vmatmul.mubr.msk.bf16.vlgmr.msra.gmra.mrb[0].mxu1 %vm126_vm2, %v109_v10 }
 0x1e6   :  { %v164_v12 = vpop.f32.mrb[0].mxu1 }
 0x1e7   :  { %v170_v13 = vpack.c.bf16 %v164_v12, %v164_v12  ;;  %v200_v14 = vpop.f32.mrb[1].mxu1 }
 0x1e8   :  { %v167_v15 = vpop.f32.mrb[2].mxu1 }
 0x1e9   :  { %171 = vst [vmem:[%s357_s3] sm:$0xf] %v170_v13  ;;  %v201_v16 = vpop.f32.mrb[3].mxu1 }
 0x1ea   :  { %176 = vsyncpa [#allocation3], 1 }
 0x1eb   :  { %177 = vsyncpa [#allocation5], 1 }

</bundles_post_ra>
